<compile_context>
chip_gen: v7x
topology: tpu7x:2x2x1
jax: 0.10.0
libtpu: 0.0.40
codegen_flags: <defaults>
</compile_context>

<pallas_src>
import numpy as np

import jax
import jax.numpy as jnp
from jax.experimental import pallas as pl
from jax.experimental.pallas import tpu as pltpu


def _round_up(x, m):
    return ((x + m - 1) // m) * m


def _sublane(dtype):
    # Native sublane row multiple: 8 for 32-bit, 16 for 16-bit, 32 for 8-bit.
    return 8 * max(1, 4 // np.dtype(dtype).itemsize)


def _vmem_tile_bytes(shape, dtype):
    # (sublane, 128)-tile-padded VMEM footprint of a 2-D buffer.
    r, c = shape
    return (_round_up(max(int(r), 1), _sublane(dtype))
            * _round_up(max(int(c), 1), 128)
            * np.dtype(dtype).itemsize)


def _mlp_kernel(x_ref, w1_ref, b1_ref, w2_ref, b2_ref, o_ref):
    # Cast activations to the weight dtype at the MXU boundary (avoids a
    # separate wrapper-side cast pass over x in HBM; no-op for f32 weights).
    a = x_ref[...].astype(w1_ref.dtype)
    # fc1: (TB, F) @ (F, Hp) -> f32 accumulator
    h = jnp.dot(a, w1_ref[...], preferred_element_type=jnp.float32)
    # bias-add + ReLU in f32 (VPU-safe on all generations, incl. v5e)
    h = jnp.maximum(h + b1_ref[...], 0.0)
    # fc2: (TB, Hp) @ (Hp, C) -> f32 accumulator. The h cast is a full-tile
    # VPU pack per step but the MXU (not VPU) sets the per-tile cycle count
    # at these sizes — verified-safe v5e path, do not "optimize" away.
    out = jnp.dot(h.astype(w2_ref.dtype), w2_ref[...],
                  preferred_element_type=jnp.float32)
    o_ref[...] = (out + b2_ref[...]).astype(o_ref.dtype)


def prepare_params(w1, b1, w2, b2, *, compute_dtype=jnp.bfloat16):
    """One-time parameter prep: pad hidden dim to a 128-lane multiple + cast.

    Hoisted out of the forward pass so repeated inference never re-pays these
    HBM passes. Padded hidden columns of w1 are zero and the matching rows of
    w2 are zero, so the padding is an exact mathematical no-op.

    The class dim C is deliberately NOT lane-padded: with tiny C a 128-lane
    f32 output would be ~16x zero-fill HBM writeback (the dominant stream on
    this mem-bound kernel) plus a post-kernel slice pass.
    """
    F, H = w1.shape
    C = w2.shape[1]
    f32 = jnp.float32
    Hp = _round_up(H, 128)
    w1p = jnp.zeros((F, Hp), compute_dtype).at[:, :H].set(w1.astype(compute_dtype))
    b1p = jnp.zeros((1, Hp), f32).at[:, :H].set(b1.astype(f32).reshape(1, H))
    w2p = jnp.zeros((Hp, C), compute_dtype).at[:H, :].set(w2.astype(compute_dtype))
    b2p = b2.astype(f32).reshape(1, C)
    return w1p, b1p, w2p, b2p


def net_forward(x, w1p, b1p, w2p, b2p, *, out_dtype=None, tile_b=1024,
                core_parallel=False, vmem_limit_bytes=None):
    """Forward pass of Net on pre-padded params (see prepare_params).

    x:   (B, F) activations (any float dtype; cast to the weight dtype inside
         the kernel — no extra wrapper-side pass over x).
    w1p: (F, Hp), b1p: (1, Hp), w2p: (Hp, C), b2p: (1, C)
    returns (B, C) in `out_dtype` (default x.dtype). Pass a 16-bit out_dtype
    to halve the output HBM writeback.

    tile_b: batch tile for the grid path. 1024-2048 is fine even on v7x's
      64 MiB VMEM at small F (working set is dominated by the tiny resident
      weights); only shrink it / raise vmem_limit_bytes for very large F.
    core_parallel: set True on v7x so the batch grid is sharded across both
      TensorCores (pltpu.CORE_PARALLEL); leave False on v5e/v6e (1 TC).
    vmem_limit_bytes: explicit scoped-VMEM budget; auto-derived when None
      (important on v5e, whose default scoped budget is only ~16 MiB).
    """
    B, F = x.shape
    Hp = w1p.shape[1]
    C = w2p.shape[1]
    out_dtype = x.dtype if out_dtype is None else out_dtype
    out_shape = jax.ShapeDtypeStruct((B, C), out_dtype)

    # Advisory cost hint so XLA schedules neighbours around this small call.
    param_bytes = sum(int(p.size) * np.dtype(p.dtype).itemsize
                      for p in (w1p, b1p, w2p, b2p))
    cost = pl.CostEstimate(
        flops=2 * B * (F * Hp + Hp * C),
        transcendentals=0,
        bytes_accessed=(int(x.size) * np.dtype(x.dtype).itemsize + param_bytes
                        + B * C * np.dtype(out_dtype).itemsize),
    )

    # Batch tile aligned to the native sublane packing of the narrowest dtype
    # involved (16 rows for bf16, 8 for f32) so loads/stores stay unmasked.
    sub = max(_sublane(x.dtype), _sublane(w1p.dtype), _sublane(out_dtype))
    tb = _round_up(max(1, min(tile_b, B)), sub)
    n_tiles = pl.cdiv(B, tb)

    if n_tiles == 1:
        # Single tile: gridless call — no pipeline prologue/epilogue overhead.
        return pl.pallas_call(
            _mlp_kernel,
            out_shape=out_shape,
            cost_estimate=cost,
        )(x, w1p, b1p, w2p, b2p)

    if vmem_limit_bytes is None:
        # Resident weights + double-buffered x/out tiles + h scratch, with 2x
        # headroom. Explicit so v5e's small default scoped budget never binds
        # and larger tile_b stays safe.
        w_vmem = (_vmem_tile_bytes(w1p.shape, w1p.dtype)
                  + _vmem_tile_bytes(b1p.shape, b1p.dtype)
                  + _vmem_tile_bytes(w2p.shape, w2p.dtype)
                  + _vmem_tile_bytes(b2p.shape, b2p.dtype))
        io_vmem = (_vmem_tile_bytes((tb, F), x.dtype)
                   + _vmem_tile_bytes((tb, C), out_dtype))
        h_vmem = (_vmem_tile_bytes((tb, Hp), jnp.float32)
                  + _vmem_tile_bytes((tb, Hp), w2p.dtype))
        vmem_limit_bytes = min(4 * (w_vmem + io_vmem) + 2 * h_vmem + (4 << 20),
                               128 << 20)

    dim_sem = (pltpu.CORE_PARALLEL,) if core_parallel else ("parallel",)

    # Ragged final tile (B % tb != 0) is handled by Pallas block masking:
    # no wrapper-side jnp.pad of x and no post-kernel slice.
    return pl.pallas_call(
        _mlp_kernel,
        out_shape=out_shape,
        grid=(n_tiles,),
        in_specs=[
            pl.BlockSpec((tb, F), lambda i: (i, 0)),    # x tile (pipelined)
            # Constant index maps: weights/biases DMA'd once, resident in VMEM
            # across all grid steps. (For very large F, add
            # pipeline_mode=pl.Buffered(1) to drop their second buffer.)
            pl.BlockSpec((F, Hp), lambda i: (0, 0)),    # w1 (resident)
            pl.BlockSpec((1, Hp), lambda i: (0, 0)),    # b1 (resident)
            pl.BlockSpec((Hp, C), lambda i: (0, 0)),    # w2 (resident)
            pl.BlockSpec((1, C), lambda i: (0, 0)),     # b2 (resident)
        ],
        out_specs=pl.BlockSpec((tb, C), lambda i: (i, 0)),
        compiler_params=pltpu.CompilerParams(
            dimension_semantics=dim_sem,
            vmem_limit_bytes=int(vmem_limit_bytes),
        ),
        cost_estimate=cost,
    )(x, w1p, b1p, w2p, b2p)


def init_params(key, input_features, classes, expansion=2):
    """Deterministic init mirroring nn.Linear's uniform(-1/sqrt(fan_in), 1/sqrt(fan_in))."""
    hidden = expansion * input_features
    k1, k2, k3, k4 = jax.random.split(key, 4)
    bound1 = 1.0 / jnp.sqrt(input_features)
    bound2 = 1.0 / jnp.sqrt(hidden)
    # Stored as (in, out) for the kernel (transpose of PyTorch layout).
    w1 = jax.random.uniform(k1, (input_features, hidden), jnp.float32, -bound1, bound1)
    b1 = jax.random.uniform(k2, (1, hidden), jnp.float32, -bound1, bound1)
    w2 = jax.random.uniform(k3, (hidden, classes), jnp.float32, -bound2, bound2)
    b2 = jax.random.uniform(k4, (1, classes), jnp.float32, -bound2, bound2)
    return w1, b1, w2, b2


if __name__ == "__main__":
    batch = 8
    input_features = 32
    classes = 8

    key = jax.random.PRNGKey(0)
    kx, kp = jax.random.split(key)
    x = jax.random.normal(kx, (batch, input_features), jnp.float32)
    w1, b1, w2, b2 = init_params(kp, input_features, classes)

    # Plain-JAX reference
    ref = jnp.maximum(x @ w1 + b1, 0.0) @ w2 + b2

    # 1) exact fp32 path (single tile -> gridless pallas_call)
    params_f32 = prepare_params(w1, b1, w2, b2, compute_dtype=jnp.float32)
    out_f32 = jax.block_until_ready(net_forward(x, *params_f32))
    assert out_f32.shape == (batch, classes)
    assert jnp.allclose(out_f32, ref, atol=1e-5, rtol=1e-5)

    # 2) bf16-operand / f32-accumulate path (MXU fast path on v6e/v7x)
    params_bf16 = prepare_params(w1, b1, w2, b2, compute_dtype=jnp.bfloat16)
    out_bf16 = jax.block_until_ready(net_forward(x, *params_bf16))
    assert out_bf16.shape == (batch, classes)
    assert jnp.allclose(out_bf16, ref, atol=5e-2, rtol=5e-2)

    # 3) batch-tiled grid path: resident weights, ragged final tile (no pad),
    #    bf16 output writeback.
    big_batch = 1000
    xb = jax.random.normal(kx, (big_batch, input_features), jnp.float32)
    refb = jnp.maximum(xb @ w1 + b1, 0.0) @ w2 + b2
    out_big = jax.block_until_ready(
        net_forward(xb, *params_bf16, tile_b=256, out_dtype=jnp.bfloat16))
    assert out_big.shape == (big_batch, classes)
    assert jnp.allclose(out_big.astype(jnp.float32), refb, atol=5e-2, rtol=5e-2)

    print("KERNEL_OK")
</pallas_src>

<mosaic_0001>
module attributes {stable_mosaic.version = 11 : i64} {
  func.func @_mlp_kernel(%arg0: memref<8x32xf32, #tpu.memory_space<vmem>>, %arg1: memref<32x128xf32, #tpu.memory_space<vmem>>, %arg2: memref<1x128xf32, #tpu.memory_space<vmem>>, %arg3: memref<128x8xf32, #tpu.memory_space<vmem>>, %arg4: memref<1x8xf32, #tpu.memory_space<vmem>>, %arg5: memref<8x8xf32, #tpu.memory_space<vmem>>) attributes {dimension_semantics = [], scalar_prefetch = 0 : i64, scratch_operands = 0 : i64, tpu.core_type = #tpu.core_type<tc>} {
    %c0 = arith.constant 0 : index
    %c0_0 = arith.constant 0 : index
    %0 = vector.load %arg0[%c0, %c0_0] : memref<8x32xf32, #tpu.memory_space<vmem>>, vector<8x32xf32>
    %c0_1 = arith.constant 0 : index
    %c0_2 = arith.constant 0 : index
    %1 = vector.load %arg1[%c0_1, %c0_2] : memref<32x128xf32, #tpu.memory_space<vmem>>, vector<32x128xf32>
    %cst = arith.constant dense<0.000000e+00> : vector<8x128xf32>
    %2 = tpu.matmul %0, %1, %cst {dimension_numbers = #tpu.dot_dimension_numbers<[1], [0], [0], [1], [0, 0, 1, 1], [], []>} : vector<8x32xf32>, vector<32x128xf32>, vector<8x128xf32> -> vector<8x128xf32>
    %c0_3 = arith.constant 0 : index
    %c0_4 = arith.constant 0 : index
    %3 = vector.load %arg2[%c0_3, %c0_4] : memref<1x128xf32, #tpu.memory_space<vmem>>, vector<1x128xf32>
    %4 = vector.broadcast %3 : vector<1x128xf32> to vector<8x128xf32>
    %5 = arith.addf %2, %4 : vector<8x128xf32>
    %cst_5 = arith.constant 0.000000e+00 : f32
    %6 = vector.broadcast %cst_5 : f32 to vector<8x128xf32>
    %7 = arith.maximumf %5, %6 : vector<8x128xf32>
    %c0_6 = arith.constant 0 : index
    %c0_7 = arith.constant 0 : index
    %8 = vector.load %arg3[%c0_6, %c0_7] : memref<128x8xf32, #tpu.memory_space<vmem>>, vector<128x8xf32>
    %cst_8 = arith.constant dense<0.000000e+00> : vector<8x8xf32>
    %9 = tpu.matmul %7, %8, %cst_8 {dimension_numbers = #tpu.dot_dimension_numbers<[1], [0], [0], [1], [0, 0, 1, 1], [], []>} : vector<8x128xf32>, vector<128x8xf32>, vector<8x8xf32> -> vector<8x8xf32>
    %c0_9 = arith.constant 0 : index
    %c0_10 = arith.constant 0 : index
    %10 = vector.load %arg4[%c0_9, %c0_10] : memref<1x8xf32, #tpu.memory_space<vmem>>, vector<1x8xf32>
    %11 = vector.broadcast %10 : vector<1x8xf32> to vector<8x8xf32>
    %12 = arith.addf %9, %11 : vector<8x8xf32>
    %c0_11 = arith.constant 0 : index
    %c0_12 = arith.constant 0 : index
    %13 = vector.load %arg5[%c0_11, %c0_12] : memref<8x8xf32, #tpu.memory_space<vmem>>, vector<8x8xf32>
    tpu.vector_store %arg5[%c0_11, %c0_12], %12 {strides = array<i32>} : memref<8x8xf32, #tpu.memory_space<vmem>>, vector<8x8xf32>,
    return
  }
}

</mosaic_0001>

<bundles_post_ra>
// kernel: tpu_custom_call.1
= control target key start
LH: loop header
LB: loop body
LE: loop exit
PB: predicated region body
PF: predicated region fallthrough
CT: control target
= control target key end

     0   :  { %v346_v3 = vmov 0.0|0.0   ;;  %vm347_vm0 = vmmov 0   ;;  %v348_v6 = vmov 0.0   ;;  %s461_s0 = inlined_call_operand.vmem [shape: f32[8,32], index: 0, kind: input, shape index: {}]   ;;  %s462_s1 = inlined_call_operand.vmem [shape: f32[32,128], index: 1, kind: input, shape index: {}]   ;;  %s463_s2 = inlined_call_operand.vmem [shape: f32[1,128], index: 2, kind: input, shape index: {}]   ;;  %s464_s3 = inlined_call_operand.vmem [shape: f32[128,8], index: 3, kind: input, shape index: {}]   ;;  %s465_s4 = inlined_call_operand.vmem [shape: f32[1,8], index: 4, kind: input, shape index: {}]   ;;  %s466_s5 = inlined_call_operand.hbm [shape: f32[8,8], index: 5, kind: output, shape index: {}]  }
   0x1   :  { %v22_v0 = vld [vmem:[%s462_s1] sm:$0xff]  ;;  %v23_v1 = vld [vmem:[%s462_s1 + $0x8] sm:$0xff]  ;;  %v24_v2 = vld [vmem:[%s462_s1 + $0x10] sm:$0xff]  ;;  %288 = vmatprep.subr.bf16.mxu0 %v346_v3  ;;  %250 = vmatprep.mubr.msk.f32.mxu0 %vm347_vm0, %v348_v6 }
   0x2   :  { %v289_v4 = vpack.c.bf16 %v23_v1, %v22_v0  ;;  %v25_v5 = vld [vmem:[%s462_s1 + $0x18] sm:$0xff]  ;;  %v108_v7 = vld [vmem:[%s464_s3] sm:$0xff]  ;;  %294 = vmatprep.subr.bf16.mxu1 %v346_v3  ;;  %v109_v8 = vld [vmem:[%s464_s3 + $0x8] sm:$0xff]  ;;  %285 = vmatprep.mubr.msk.f32.mxu1 %vm347_vm0, %v348_v6 }
   0x3   :  { %v110_v9 = vld [vmem:[%s464_s3 + $0x10] sm:$0xff]  ;;  %v111_v10 = vld [vmem:[%s464_s3 + $0x18] sm:$0xff]  ;;  %v292_v11 = vpack.c.bf16 %v25_v5, %v24_v2  ;;  %v295_v12 = vpack.c.bf16 %v109_v8, %v108_v7  ;;  %v112_v14 = vld [vmem:[%s464_s3 + $0x20] sm:$0xff] }
   0x4   :  { %290 = vmatpush3.bf16.msra.mxu0 %v289_v4  ;;  %v298_v13 = vpack.c.bf16 %v111_v10, %v110_v9  ;;  %v113_v15 = vld [vmem:[%s464_s3 + $0x28] sm:$0xff] }
   0x5   :  { %291 = vmatprep.subr.bf16.mxu0 %v346_v3  ;;  %296 = vmatpush3.bf16.msra.mxu1 %v295_v12 }
   0x6   :  { %297 = vmatprep.subr.bf16.mxu1 %v346_v3 }
   0x7   :  { %10 = vsyncpa [#allocation3], 0  ;;  %v21_v16 = vld [vmem:[%s461_s0] sm:$0xff]  ;;  %vm33_vm1 = vcmask 261120   ;;  %v301_v17 = vpack.c.bf16 %v113_v15, %v112_v14  ;;  %v114_v18 = vld [vmem:[%s464_s3 + $0x30] sm:$0xff]  ;;  %s349_s11 = smov [#allocation2]  }
   0x8   :  { %293 = vmatpush3.bf16.msra.mxu0 %v292_v11  ;;  %v115_v19 = vld [vmem:[%s464_s3 + $0x38] sm:$0xff]  ;;  %v116_v21 = vld [vmem:[%s464_s3 + $0x40] sm:$0xff]  ;;  %v117_v22 = vld [vmem:[%s464_s3 + $0x48] sm:$0xff]  ;;  %s209_s12 = sshll.u32 %s349_s11, 4  ;;  %vm201_vm2 = vcmask 64512   ;;  %s210_s12 = int_to_ptr.vmem [resolvable:$true] %s209_s12 }
   0x9   :  { %299 = vmatpush3.bf16.msra.mxu1 %v298_v13  ;;  %v304_v20 = vpack.c.bf16 %v115_v19, %v114_v18  ;;  %v307_v23 = vpack.c.bf16 %v117_v22, %v116_v21  ;;  %v118_v24 = vld [vmem:[%s464_s3 + $0x50] sm:$0xff]  ;;  %v119_v25 = vld [vmem:[%s464_s3 + $0x58] sm:$0xff]  ;;  %v120_v27 = vld [vmem:[%s464_s3 + $0x60] sm:$0xff]  ;;  %p327_p1 = scmp.lt.s32.totalorder %s210_s12, %s210_s12 }
   0xa   :  { %300 = vmatprep.subr.bf16.mxu1 %v346_v3  ;;  %v310_v26 = vpack.c.bf16 %v119_v25, %v118_v24  ;;  %v121_v28 = vld [vmem:[%s464_s3 + $0x68] sm:$0xff]  ;;  %v122_v30 = vld [vmem:[%s464_s3 + $0x70] sm:$0xff]  ;;  %v123_v31 = vld [vmem:[%s464_s3 + $0x78] sm:$0xff]  ;;  %s322_s3 = scalar_lea.vmem %s210_s12, 128 }
   0xb   :  { %251 = vmatmul.mubr.msk.f32.vlgmr.msra.gmra.mrb[0].mxu0 %vm33_vm1, %v21_v16  ;;  %v313_v29 = vpack.c.bf16 %v121_v28, %v120_v27  ;;  %v316_v32 = vpack.c.bf16 %v123_v31, %v122_v30  ;;  %v217_v33 = vld [vmem:[%s463_s2] ss:$0 sm:$0xff]  ;;  %p323_p0 = scmp.ne.s32.totalorder %s210_s12, %s322_s3  ;;  %p328_p2 = scmp.lt.s32.totalorder %s322_s3, %s322_s3 }
   0xc   :  { %v219_v38 = vld [vmem:[%s465_s4] ss:$0 sm:$0xff] }
   0xd   :  { %302 = vmatpush3.bf16.msra.mxu1 %v301_v17  ;;  %p329_p3 = por %p328_p2, %p327_p1 }
   0xe   :  { %303 = vmatprep.subr.bf16.mxu1 %v346_v3 }
   0xf   :  { %p330_p4 = pnand %p329_p3, %p323_p0 }
  0x11   :  { %305 = vmatpush3.bf16.msra.mxu1 %v304_v20 }
  0x12   :  { %306 = vmatprep.subr.bf16.mxu1 %v346_v3 }
  0x15   :  { %308 = vmatpush3.bf16.msra.mxu1 %v307_v23 }
  0x16   :  { %309 = vmatprep.subr.bf16.mxu1 %v346_v3 }
  0x19   :  { %311 = vmatpush3.bf16.msra.mxu1 %v310_v26 }
  0x1a   :  { %312 = vmatprep.subr.bf16.mxu1 %v346_v3 }
  0x1d   :  { %314 = vmatpush3.bf16.msra.mxu1 %v313_v29 }
  0x1e   :  { %315 = vmatprep.subr.bf16.mxu1 %v346_v3 }
  0x21   :  { %317 = vmatpush3.bf16.msra.mxu1 %v316_v32 }
  0xde   :  { %v103_v34 = vpop.f32.mrb[0].mxu0 }
  0xdf   :  { %v104_v35 = vadd.f32 %v217_v33, %v103_v34  ;;  %v252_v36 = vpop.f32.mrb[1].mxu0 }
  0xe1   :  { %v107_v37 = vmax.f32 %v104_v35, 0.0 }
  0xe3   :  { %286 = vmatmul.mubr.f32.vlgmr.msra.gmra.mrb[0].mxu1 %v107_v37 }
 0x1b6   :  { %v197_v39 = vpop.f32.mrb[0].mxu1 }
 0x1b7   :  { %v198_v40 = vadd.f32 %v219_v38, %v197_v39  ;;  %v287_v41 = vpop.f32.mrb[1].mxu1 }
 0x1b9   :  { %202 = vst.msk [vmem:[#allocation2] sm:$0xff] %vm201_vm2, %v198_v40 }
 0x1ba   :  { %333 = shalt.err (!%p330_p4)
}
 0x1bb   :  { %s334_s14 = scalar_lea.hbm %s466_s5, 128 }
 0x1bc   :  { %p335_p5 = scmp.ne.s32.totalorder %s466_s5, %s334_s14  ;;  %p338_p6 = scmp.lt.u32.totalorder %s334_s14, %s466_s5 }
 0x1be   :  { %p340_p7 = pnand %p338_p6, %p335_p5 }
 0x1c0   :  { %343 = shalt.err (!%p340_p7)
}
 0x1c1   :  { %212 = dma.vmem_to_hbm [thread:$0]  %s210_s12, 128, %s466_s5, [#allocation3]  }
 0x1c2   :  { %344 = dma.done.wait [#allocation3], 128  }
 0x1c3   :  { %345 = vsyncadd [#allocation3], 4294967168 }
 0x1c4   :  { %216 = vsyncpa [#allocation3], 1 }

</bundles_post_ra>
